<compile_context>
chip_gen: v6e
topology: v6e:2x2x1
jax: 0.10.0
libtpu: 0.0.40
codegen_flags: <defaults>
</compile_context>

<pallas_src>
import functools

import jax
import jax.numpy as jnp
from jax import lax
from jax.experimental import pallas as pl
from jax.experimental.pallas import tpu as pltpu

LANE = 128
SUBLANE = 8
DESIRED_TILE_ROWS = 8192      # 8192 rows * 128 lanes * 4 B = 4 MiB per input block
CHUNK_ROWS = 512              # in-kernel processing chunk (~256 KiB f32 temps)
VMEM_LIMIT_BYTES = 40 * 1024 * 1024


def _kl_partial_sum_kernel(mu_ref, lv_ref, out_ref, *,
                           tile_rows, chunk_rows, total_rows, needs_mask):
    i = pl.program_id(0)

    @pl.when(i == 0)
    def _():
        out_ref[...] = jnp.zeros_like(out_ref)

    num_chunks = tile_rows // chunk_rows
    groups = chunk_rows // SUBLANE

    def run(masked):
        tile_start = i * tile_rows

        def body(c, acc):
            r0 = pl.multiple_of(c * chunk_rows, chunk_rows)
            mu = mu_ref[pl.ds(r0, chunk_rows), :].astype(jnp.float32)
            lv = lv_ref[pl.ds(r0, chunk_rows), :].astype(jnp.float32)
            if masked:
                # Row-granularity validity predicate; zeroing mu/log_var BEFORE
                # any arithmetic makes the padded/garbage rows contribute
                # exactly 0 to the KL sum (1 + 0 - 0 - exp(0) = 0).
                row_ids = tile_start + r0 + lax.broadcasted_iota(
                    jnp.int32, (chunk_rows, 1), 0)
                valid = row_ids < total_rows
                mu = jnp.where(valid, mu, 0.0)
                lv = jnp.where(valid, lv, 0.0)
            term = 1.0 + lv - mu * mu - jnp.exp(lv)
            # Fold into an (8, 128) vreg-shaped partial sum: pure VPU adds.
            return acc + term.reshape(groups, SUBLANE, LANE).sum(axis=0)

        acc = lax.fori_loop(0, num_chunks, body,
                            jnp.zeros((SUBLANE, LANE), jnp.float32))
        out_ref[...] += acc

    if needs_mask:
        # Only the final grid step can contain rows beyond the logical extent.
        is_last = i == pl.num_programs(0) - 1

        @pl.when(jnp.logical_not(is_last))
        def _():
            run(masked=False)

        @pl.when(is_last)
        def _():
            run(masked=True)
    else:
        run(masked=False)


def kl_divergence_standard_normal(mu: jax.Array, log_var: jax.Array) -> jax.Array:
    """Pallas TPU implementation of -0.5 * mean(1 + log_var - mu**2 - exp(log_var))."""
    assert mu.shape == log_var.shape
    count = mu.size

    mu_flat = mu.reshape(-1)
    lv_flat = log_var.reshape(-1)

    main = count - (count % LANE)
    rows = main // LANE

    if rows < SUBLANE:
        # Tiny input (< ~1 KiB): plain JAX is both correct and faster.
        mu_f = mu_flat.astype(jnp.float32)
        lv_f = lv_flat.astype(jnp.float32)
        total = jnp.sum(1.0 + lv_f - mu_f * mu_f - jnp.exp(lv_f))
        return -0.5 * (total / count)

    # Sub-128-element ragged tail handled in plain JAX (at most 127 elements).
    if main < count:
        # NOTE: only when count % 128 != 0; the [:main] slice below then costs
        # one XLA copy of the main region.
        mu_t = mu_flat[main:].astype(jnp.float32)
        lv_t = lv_flat[main:].astype(jnp.float32)
        tail_sum = jnp.sum(1.0 + lv_t - mu_t * mu_t - jnp.exp(lv_t))
    else:
        tail_sum = jnp.float32(0.0)

    mu2d = mu_flat[:main].reshape(rows, LANE)
    lv2d = lv_flat[:main].reshape(rows, LANE)

    # chunk_rows: multiple of 8, <= rows; tile_rows: multiple of chunk_rows,
    # <= min(DESIRED_TILE_ROWS, rows). Only the last tile can be ragged.
    chunk_rows = min(CHUNK_ROWS, (rows // SUBLANE) * SUBLANE)
    tile_rows = min(DESIRED_TILE_ROWS, (rows // chunk_rows) * chunk_rows)
    num_tiles = pl.cdiv(rows, tile_rows)
    needs_mask = (rows % tile_rows) != 0

    kernel = functools.partial(
        _kl_partial_sum_kernel,
        tile_rows=tile_rows,
        chunk_rows=chunk_rows,
        total_rows=rows,
        needs_mask=needs_mask,
    )

    partials = pl.pallas_call(
        kernel,
        out_shape=jax.ShapeDtypeStruct((SUBLANE, LANE), jnp.float32),
        grid_spec=pltpu.PrefetchScalarGridSpec(
            num_scalar_prefetch=0,
            grid=(num_tiles,),
            in_specs=[
                pl.BlockSpec((tile_rows, LANE), lambda i: (i, 0)),
                pl.BlockSpec((tile_rows, LANE), lambda i: (i, 0)),
            ],
            out_specs=pl.BlockSpec((SUBLANE, LANE), lambda i: (0, 0)),
        ),
        compiler_params=pltpu.CompilerParams(
            dimension_semantics=("arbitrary",),
            vmem_limit_bytes=VMEM_LIMIT_BYTES,
        ),
        cost_estimate=pl.CostEstimate(
            flops=5 * count,
            transcendentals=count,
            bytes_accessed=2 * count * mu.dtype.itemsize + SUBLANE * LANE * 4,
        ),
    )(mu2d, lv2d)

    total = partials.sum() + tail_sum
    return -0.5 * (total / count)


def _reference(mu, log_var):
    return -0.5 * jnp.mean(1.0 + log_var - mu**2 - jnp.exp(log_var))


if __name__ == "__main__":
    key = jax.random.PRNGKey(0)
    k1, k2 = jax.random.split(key)
    # Typical VAE latent stats, NCHW-like shape: [batch=2, channels=4, 16, 16]
    mu = jax.random.normal(k1, (2, 4, 16, 16), dtype=jnp.float32)
    log_var = 0.5 * jax.random.normal(k2, (2, 4, 16, 16), dtype=jnp.float32)

    out = kl_divergence_standard_normal(mu, log_var)
    out = jax.block_until_ready(out)

    ref = _reference(mu, log_var)
    assert jnp.allclose(out, ref, rtol=1e-5, atol=1e-6), (out, ref)
    print("KERNEL_OK")
</pallas_src>

<mosaic_0001>
module attributes {stable_mosaic.version = 11 : i64} {
  func.func @_kl_partial_sum_kernel(%arg0: i32, %arg1: memref<16x128xf32, #tpu.memory_space<vmem>>, %arg2: memref<16x128xf32, #tpu.memory_space<vmem>>, %arg3: memref<8x128xf32, #tpu.memory_space<vmem>>) attributes {dimension_semantics = [#tpu.dimension_semantics<arbitrary>], iteration_bounds = array<i64: 1>, scalar_prefetch = 0 : i64, scratch_operands = 0 : i64, tpu.core_type = #tpu.core_type<tc>, window_params = [{transform_indices = @transform_0, window_bounds = array<i64: 16, 128>}, {transform_indices = @transform_1, window_bounds = array<i64: 16, 128>}, {pipeline_mode = #tpu.pipeline_mode<synchronous>, transform_indices = @transform_2, window_bounds = array<i64: 8, 128>}]} {
    %c0_i32 = arith.constant 0 : i32
    %0 = arith.cmpi eq, %arg0, %c0_i32 : i32
    %1 = arith.extui %0 : i1 to i32
    %c0_i32_0 = arith.constant 0 : i32
    %2 = arith.cmpi ne, %1, %c0_i32_0 : i32
    scf.if %2 {
      %cst_9 = arith.constant 0.000000e+00 : f32
      %22 = vector.broadcast %cst_9 : f32 to vector<8x128xf32>
      %c0_10 = arith.constant 0 : index
      %c0_11 = arith.constant 0 : index
      %23 = vector.load %arg3[%c0_10, %c0_11] : memref<8x128xf32, #tpu.memory_space<vmem>>, vector<8x128xf32>
      tpu.vector_store %arg3[%c0_10, %c0_11], %22 {strides = array<i32>} : memref<8x128xf32, #tpu.memory_space<vmem>>, vector<8x128xf32>,
    } else {
    }
    %cst = arith.constant 0.000000e+00 : f32
    %3 = vector.broadcast %cst : f32 to vector<8x128xf32>
    %c0_i32_1 = arith.constant 0 : i32
    %c16_i32 = arith.constant 16 : i32
    %4 = arith.muli %c0_i32_1, %c16_i32 : i32
    %5 = tpu.assume_multiple %4, 16 : i32
    %6 = arith.index_cast %5 : i32 to index
    %c0 = arith.constant 0 : index
    %7 = vector.load %arg1[%6, %c0] : memref<16x128xf32, #tpu.memory_space<vmem>>, vector<16x128xf32>
    %8 = arith.index_cast %5 : i32 to index
    %c0_2 = arith.constant 0 : index
    %9 = vector.load %arg2[%8, %c0_2] : memref<16x128xf32, #tpu.memory_space<vmem>>, vector<16x128xf32>
    %cst_3 = arith.constant 1.000000e+00 : f32
    %10 = vector.broadcast %cst_3 : f32 to vector<16x128xf32>
    %11 = arith.addf %10, %9 : vector<16x128xf32>
    %12 = arith.mulf %7, %7 : vector<16x128xf32>
    %13 = arith.subf %11, %12 : vector<16x128xf32>
    %14 = math.exp %9 : vector<16x128xf32>
    %15 = arith.subf %13, %14 : vector<16x128xf32>
    %16 = vector.shape_cast %15 : vector<16x128xf32> to vector<2x8x128xf32>
    %cst_4 = arith.constant dense<0.000000e+00> : vector<8x128xf32>
    %17 = vector.multi_reduction <add>, %16, %cst_4 [0] : vector<2x8x128xf32> to vector<8x128xf32>
    %18 = arith.addf %3, %17 : vector<8x128xf32>
    %c1_i32 = arith.constant 1 : i32
    %c0_5 = arith.constant 0 : index
    %c0_6 = arith.constant 0 : index
    %19 = vector.load %arg3[%c0_5, %c0_6] : memref<8x128xf32, #tpu.memory_space<vmem>>, vector<8x128xf32>
    %20 = arith.addf %19, %18 : vector<8x128xf32>
    %c0_7 = arith.constant 0 : index
    %c0_8 = arith.constant 0 : index
    %21 = vector.load %arg3[%c0_7, %c0_8] : memref<8x128xf32, #tpu.memory_space<vmem>>, vector<8x128xf32>
    tpu.vector_store %arg3[%c0_7, %c0_8], %20 {strides = array<i32>} : memref<8x128xf32, #tpu.memory_space<vmem>>, vector<8x128xf32>,
    return
  }
  func.func @transform_0(%arg0: i32) -> (i32, i32) {
    %c0_i32 = arith.constant 0 : i32
    %c0_i32_0 = arith.constant 0 : i32
    return %arg0, %c0_i32 : i32, i32
  }
  func.func @transform_1(%arg0: i32) -> (i32, i32) {
    %c0_i32 = arith.constant 0 : i32
    %c0_i32_0 = arith.constant 0 : i32
    return %arg0, %c0_i32 : i32, i32
  }
  func.func @transform_2(%arg0: i32) -> (i32, i32) {
    %c0_i32 = arith.constant 0 : i32
    %c0_i32_0 = arith.constant 0 : i32
    %c0_i32_1 = arith.constant 0 : i32
    return %c0_i32, %c0_i32_0 : i32, i32
  }
}

</mosaic_0001>

<bundles_post_ra>
// kernel: tpu_custom_call.1
= control target key start
LH: loop header
LB: loop body
LE: loop exit
PB: predicated region body
PF: predicated region fallthrough
CT: control target
= control target key end

     0   :  { %7 = vsyncpa [#allocation3], 0  ;;  %s187_s0 = inlined_call_operand.hbm [shape: f32[16,128], index: 0, kind: input, shape index: {}]   ;;  %s188_s1 = inlined_call_operand.hbm [shape: f32[16,128], index: 1, kind: input, shape index: {}]   ;;  %s189_s2 = inlined_call_operand.hbm [shape: f32[8,128], index: 2, kind: output, shape index: {}]  }
   0x1   :  { %8 = vsyncpa [#allocation6], 0 }
   0x2   :  { %9 = vsyncpa [#allocation4], 0  ;;  %s158_s9 = smov [#allocation2]  }
   0x3   :  { %s15_s10 = sshll.u32 %s158_s9, 4  ;;  %s16_s10 = int_to_ptr.vmem [resolvable:$true] %s15_s10 }
   0x4   :  { %s100_s11 = scalar_lea.vmem %s16_s10, 256  ;;  %p105_p1 = scmp.lt.s32.totalorder %s16_s10, %s16_s10 }
   0x5   :  { %p101_p0 = scmp.ne.s32.totalorder %s16_s10, %s100_s11  ;;  %p106_p2 = scmp.lt.s32.totalorder %s100_s11, %s100_s11 }
   0x7   :  { %p107_p3 = por %p106_p2, %p105_p1 }
   0x9   :  { %p108_p4 = pnand %p107_p3, %p101_p0 }
   0xb   :  { %111 = shalt.err (!%p108_p4)
}
   0xc   :  { %s159_s12 = smov 128   ;;  %s160_s13 = smov 8  }
   0xd   :  { %21 = dma.hbm_to_vmem [thread:$0]  %s187_s0, 256, %s16_s10, [#allocation3], %s159_s12, %s159_s12, %s160_s13  }
   0xe   :  { %s161_s16 = smov [#allocation5]  }
   0xf   :  { %s27_s17 = sshll.u32 %s161_s16, 4  ;;  %s28_s17 = int_to_ptr.vmem [resolvable:$true] %s27_s17 }
  0x10   :  { %s120_s18 = scalar_lea.vmem %s28_s17, 256  ;;  %p125_p6 = scmp.lt.s32.totalorder %s28_s17, %s28_s17 }
  0x11   :  { %p121_p5 = scmp.ne.s32.totalorder %s28_s17, %s120_s18  ;;  %p126_p7 = scmp.lt.s32.totalorder %s120_s18, %s120_s18 }
  0x13   :  { %p127_p8 = por %p126_p7, %p125_p6 }
  0x15   :  { %p128_p9 = pnand %p127_p8, %p121_p5 }
  0x17   :  { %131 = shalt.err (!%p128_p9)
}
  0x18   :  { %33 = dma.hbm_to_vmem [thread:$0]  %s188_s1, 256, %s28_s17, [#allocation6], %s159_s12, %s159_s12, %s160_s13  }
  0x19   :  { %152 = dma.done.wait [#allocation3], 256  }
  0x1a   :  { %153 = vsyncadd [#allocation3], 4294967040 }
  0x1b   :  { %154 = dma.done.wait [#allocation6], 256  }
  0x1c   :  { %155 = vsyncadd [#allocation6], 4294967040  ;;  %v47_v0 = vld [vmem:[#allocation5] sm:$0xff]  ;;  %v48_v1 = vld [vmem:[#allocation5 + $0x8] sm:$0xff]  ;;  %s162_s0 = smov [#allocation7]  }
  0x1d   :  { %v55_v2 = vmul.f32 1.442695, %v47_v0  ;;  %v57_v3 = vmul.f32 1.442695, %v48_v1  ;;  %v45_v4 = vld [vmem:[#allocation2] sm:$0xff]  ;;  %v46_v5 = vld [vmem:[#allocation2 + $0x8] sm:$0xff] }
  0x1e   :  { %v49_v6 = vadd.f32 1.0, %v47_v0  ;;  %v51_v7 = vmul.f32 %v45_v4, %v45_v4  ;;  %v50_v8 = vadd.f32 1.0, %v48_v1  ;;  %v52_v9 = vmul.f32 %v46_v5, %v46_v5  ;;  %s72_s1 = sshll.u32 %s162_s0, 4  ;;  %s73_s1 = int_to_ptr.vmem [resolvable:$true] %s72_s1 }
  0x1f   :  { %88 = vpow2.f32 %v55_v2  ;;  %s132_s21 = scalar_lea.vmem %s73_s1, 128  ;;  %p137_p11 = scmp.lt.s32.totalorder %s73_s1, %s73_s1 }
  0x20   :  { %90 = vpow2.f32 %v57_v3  ;;  %v53_v10 = vsub.f32 %v49_v6, %v51_v7  ;;  %v54_v11 = vsub.f32 %v50_v8, %v52_v9  ;;  %p133_p10 = scmp.ne.s32.totalorder %s73_s1, %s132_s21  ;;  %p138_p12 = scmp.lt.s32.totalorder %s132_s21, %s132_s21 }
  0x22   :  { %p139_p13 = por %p138_p12, %p137_p11 }
  0x24   :  { %p140_p0 = pnand %p139_p13, %p133_p10 }
  0x2c   :  { %v89_v12 = vpop.eup %88 }
  0x2d   :  { %v91_v13 = vpop.eup %90  ;;  %v59_v14 = vsub.f32 %v53_v10, %v89_v12 }
  0x2e   :  { %v60_v15 = vsub.f32 %v54_v11, %v91_v13 }
  0x30   :  { %v61_v16 = vadd.f32 %v60_v15, %v59_v14 }
  0x32   :  { %65 = vst [vmem:[#allocation7] sm:$0xff] %v61_v16 }
  0x33   :  { %143 = shalt.err (!%p140_p0)
}
  0x34   :  { %75 = dma.vmem_to_hbm [thread:$0]  %s73_s1, 128, %s189_s2, [#allocation4]  }
  0x35   :  { %156 = dma.done.wait [#allocation4], 128  }
  0x36   :  { %157 = vsyncadd [#allocation4], 4294967168 }
  0x37   :  { %79 = vsyncpa [#allocation3], 1 }
  0x38   :  { %80 = vsyncpa [#allocation6], 1 }
  0x39   :  { %81 = vsyncpa [#allocation4], 1 }

</bundles_post_ra>
